<compile_context>
chip_gen: v5e
topology: v5e:2x2
jax: 0.10.0
libtpu: 0.0.40
codegen_flags: <defaults>
</compile_context>

<pallas_src>
import functools
import math

import numpy as np
import jax
import jax.numpy as jnp
from jax.experimental import pallas as pl
from jax.experimental.pallas import tpu as pltpu


# ----------------------------------------------------------------------------
# Problem configuration (mirrors the PyTorch module's __init__)
# ----------------------------------------------------------------------------
def get_basic_node_amount(modal):
    # Synthetic node counts (the original helper is not provided).
    return {"E": 6, "A": 2, "E-A": 8}[modal]


def eca_kernel_size(channel, gamma=2, b=1):
    t = int(abs((math.log(channel, 2) + b) / gamma))
    k = t if t % 2 else t + 1
    return max(3, k)


# ----------------------------------------------------------------------------
# Host-side glue: banded matrix for a 1-D "same" conv (PyTorch cross-correlation)
# ----------------------------------------------------------------------------
def conv1d_same_matrix(w_taps, n):
    """Return M (n, n) such that M @ m == conv1d(m, w_taps, padding='same')."""
    k = w_taps.shape[0]
    pad = (k - 1) // 2
    idx = jnp.arange(n)
    d = idx[None, :] - idx[:, None] + pad            # tap index for M[j, i]
    valid = (d >= 0) & (d < k)
    return jnp.where(valid, w_taps[jnp.clip(d, 0, k - 1)], 0.0).astype(jnp.float32)


# ----------------------------------------------------------------------------
# Pallas kernel: one block of `bb` whole batch elements per grid step
# ----------------------------------------------------------------------------
def _modal_channel_att_kernel(x_ref, cac_ref, gwcat_ref, bcat_ref, scate_ref,
                              o_ref, *, bb, C, inv_l):
    x = x_ref[...]                                       # (bb*C, L) f32
    R, L = x.shape

    # --- MultiModalAttention head: per-batch channel-sum of x (the (C,W)-mean
    #     normalisation and the W->H group sum are folded into gwcat). ---
    if bb == 1:
        xb = jnp.sum(x, axis=0, keepdims=True)           # (1, L)
    else:
        # (8,128)-aligned reshape when C % 8 == 0 (true for the demo); still
        # correct otherwise, just may relayout.
        xb = jnp.sum(x.reshape(bb, C, L), axis=1)        # (bb, L)

    # Fused [1x1 conv (node_modal -> 2) | ECA over H]:
    #   a[:, :2] == sigmoid(conv1x1(m_h) + bias), a[:, 2:] == sigmoid(eca_H(m_h))
    a = jax.nn.sigmoid(
        jnp.dot(xb, gwcat_ref[...], preferred_element_type=jnp.float32)
        + bcat_ref[...])                                 # (bb, 2+H)

    # Node-group broadcast + identity, pre-expanded to the H*W lanes (host)
    x3rows = jnp.dot(a, scate_ref[...],
                     preferred_element_type=jnp.float32)  # (bb, L), lane dense

    # --- ChannelAttention(64): H*W mean FIRST (lane reduce), tiny conv after ---
    m_col = jnp.sum(x, axis=1, keepdims=True) * inv_l    # (R, 1)

    # --- per-batch fused apply: out = x * (channel_att + modal_att) ---
    # bb is a small static int; the loop unrolls.  Per-batch apply keeps the
    # modal-att broadcast a (1,L)->(C,L) sublane splat and avoids an (R,L)
    # temporary slab.
    for b in range(bb):
        r0 = b * C
        att_b = jax.nn.sigmoid(
            jnp.dot(cac_ref[...], m_col[r0:r0 + C, :],
                    preferred_element_type=jnp.float32))  # (C, 1)
        o_ref[r0:r0 + C, :] = x[r0:r0 + C, :] * (att_b + x3rows[b:b + 1, :])


def _pick_num_blocks(B, C):
    """2 'parallel' batch blocks only on dual-TensorCore chips (v7x); else 1."""
    try:
        kind = jax.devices()[0].device_kind.lower()
    except Exception:
        kind = ""
    dual_tc = ("v7" in kind) or ("tpu7" in kind) or ("7x" in kind)
    if dual_tc and B % 2 == 0 and ((B // 2) * C) % 8 == 0:
        return 2
    return 1


def modal_channel_attention(x, ca_c_mat, cah_mat, w_mm, b_mm, node_E,
                            *, num_blocks=None):
    """x: (B, C, H, W) float32."""
    B, C, H, W = x.shape
    L = H * W

    if num_blocks is None:
        num_blocks = _pick_num_blocks(B, C)
    assert B % num_blocks == 0
    bb = B // num_blocks
    R = bb * C
    # (8,128) rule: a partial block's leading dim must be a sublane multiple;
    # otherwise fall back to one full-array block (always legal).
    if num_blocks > 1 and R % 8 != 0:
        num_blocks, bb, R = 1, B, B * C

    # ---- host-side glue: tiny constant matrices ----
    x_flat = x.reshape(B * C, L)                                      # free view

    h_of = jnp.arange(L) // W                                         # (L,)
    wcat = jnp.concatenate([w_mm.T.astype(jnp.float32),
                            cah_mat.T.astype(jnp.float32)], axis=1)   # (H, 2+H)
    gwcat = wcat[h_of, :] * (1.0 / (C * W))                           # (L, 2+H)
    bcat = jnp.concatenate([b_mm.astype(jnp.float32),
                            jnp.zeros((H,), jnp.float32)]).reshape(1, 2 + H)
    sel = (jnp.arange(H) < node_E).astype(jnp.float32)
    scat = jnp.concatenate([sel[None, :], (1.0 - sel)[None, :],
                            jnp.eye(H, dtype=jnp.float32)], axis=0)   # (2+H, H)
    scate = scat[:, h_of]                                             # (2+H, L)
    cac = ca_c_mat.astype(jnp.float32)                                # (C, C)

    # ---- advisory cost estimate (single streaming pass over x) ----
    flops = int(num_blocks * (4 * R * L                # two reductions over x
                              + 4 * bb * (2 + H) * L   # two tiny matmuls
                              + 2 * bb * C * C         # per-batch channel conv
                              + 2 * R * L))            # fused apply
    transcendentals = int(B * C + B * (2 + H))
    bytes_accessed = int(4 * (2 * B * C * L
                              + num_blocks * (C * C + L * (2 + H) + (2 + H)
                                              + (2 + H) * L)))

    # explicit VMEM budget: double-buffered x/out blocks + constants + slack,
    # capped well below v7x's 64 MiB physical VMEM.
    vmem_needed = 4 * (4 * R * L + 2 * (C * C + 2 * (2 + H) * L + (2 + H)))
    vmem_limit = int(min(max(vmem_needed + (4 << 20), 32 << 20), 48 << 20))

    kernel = functools.partial(_modal_channel_att_kernel,
                               bb=bb, C=C, inv_l=1.0 / L)

    out_flat = pl.pallas_call(
        kernel,
        out_shape=jax.ShapeDtypeStruct((B * C, L), jnp.float32),
        grid=(num_blocks,),
        in_specs=[
            pl.BlockSpec((R, L), lambda i: (i, 0)),          # x slab (lane-dense)
            pl.BlockSpec((C, C), lambda i: (0, 0)),          # channel-ECA conv matrix
            pl.BlockSpec((L, 2 + H), lambda i: (0, 0)),      # folded [conv1x1|ECA_H] + mean + group-sum
            pl.BlockSpec((1, 2 + H), lambda i: (0, 0)),      # fused bias
            pl.BlockSpec((2 + H, L), lambda i: (0, 0)),      # [S; I] @ Hexp expansion
        ],
        out_specs=pl.BlockSpec((R, L), lambda i: (i, 0)),
        compiler_params=pltpu.CompilerParams(
            dimension_semantics=("parallel",),
            vmem_limit_bytes=vmem_limit),
        cost_estimate=pl.CostEstimate(flops=flops,
                                      transcendentals=transcendentals,
                                      bytes_accessed=bytes_accessed),
    )(x_flat, cac, gwcat, bcat, scate)

    return out_flat.reshape(B, C, H, W)


# ----------------------------------------------------------------------------
# Pure-JAX reference (mirrors the PyTorch forward exactly)
# ----------------------------------------------------------------------------
def reference(x, ca_c_mat, cah_mat, w_mm, b_mm, node_E):
    b, c, h, w = x.shape
    # ChannelAttention(64) on x
    m_c = jnp.mean(x, axis=(2, 3))                                    # (b, c)
    ca = jax.nn.sigmoid(jnp.einsum("ji,bi->bj", ca_c_mat, m_c))       # (b, c)
    chan_feat = x * ca[:, :, None, None]
    # MultiModalAttention on x
    px = jnp.transpose(x, (0, 2, 1, 3))                               # (b, h, c, w)
    m_h = jnp.mean(px, axis=(2, 3))                                   # (b, h)
    x1 = jax.nn.sigmoid(jnp.einsum("oi,bi->bo", w_mm, m_h) + b_mm)    # (b, 2)
    v_modal = jnp.concatenate(
        [jnp.repeat(x1[:, :1], node_E, axis=1),
         jnp.repeat(x1[:, 1:], h - node_E, axis=1)], axis=1)          # (b, h)
    x2 = jax.nn.sigmoid(jnp.einsum("ji,bi->bj", cah_mat, m_h))        # (b, h)
    x3 = v_modal + x2
    modal_feat = jnp.transpose(px * x3[:, :, None, None], (0, 2, 1, 3))
    return chan_feat + modal_feat


# ----------------------------------------------------------------------------
if __name__ == "__main__":
    modal = "E-A"
    node_E = get_basic_node_amount("E")          # 6
    node_modal = get_basic_node_amount(modal)    # 8  (== H)

    B, C, H, W = 2, 8, node_modal, 16            # H*W == 128 -> fully lane-dense

    key = jax.random.PRNGKey(0)
    kx, k1, k2, k3, k4 = jax.random.split(key, 5)

    x = jax.random.normal(kx, (B, C, H, W), dtype=jnp.float32)

    # Deterministic synthetic parameters (shapes match the PyTorch module):
    k_c = eca_kernel_size(64)            # ChannelAttention(channel=64) -> k=3
    k_h = eca_kernel_size(node_modal)    # ChannelAttention(channel=node_modal) -> k=3
    w_ca_c = jax.random.normal(k1, (k_c,), dtype=jnp.float32) * 0.3   # Conv1d(1,1,k) weight
    w_ca_h = jax.random.normal(k2, (k_h,), dtype=jnp.float32) * 0.3   # Conv1d(1,1,k) weight
    w_mm = jax.random.normal(k3, (2, node_modal), dtype=jnp.float32) * 0.3  # Conv1d(h,2,1) weight
    b_mm = jax.random.normal(k4, (2,), dtype=jnp.float32) * 0.1             # Conv1d(h,2,1) bias

    # "same"-padded 1-D convs as banded matrices (host-side glue)
    ca_c_mat = conv1d_same_matrix(w_ca_c, C)     # (C, C)
    cah_mat = conv1d_same_matrix(w_ca_h, H)      # (H, H)

    out = modal_channel_attention(x, ca_c_mat, cah_mat, w_mm, b_mm, node_E)
    out = jax.block_until_ready(out)

    ref = reference(x, ca_c_mat, cah_mat, w_mm, b_mm, node_E)
    np.testing.assert_allclose(np.asarray(out), np.asarray(ref), rtol=1e-5, atol=1e-5)

    print("KERNEL_OK")
</pallas_src>

<mosaic_0001>
module attributes {stable_mosaic.version = 11 : i64} {
  func.func @_modal_channel_att_kernel(%arg0: i32, %arg1: memref<16x128xf32, #tpu.memory_space<vmem>>, %arg2: memref<8x8xf32, #tpu.memory_space<vmem>>, %arg3: memref<128x10xf32, #tpu.memory_space<vmem>>, %arg4: memref<1x10xf32, #tpu.memory_space<vmem>>, %arg5: memref<10x128xf32, #tpu.memory_space<vmem>>, %arg6: memref<16x128xf32, #tpu.memory_space<vmem>>) attributes {dimension_semantics = [#tpu.dimension_semantics<parallel>], iteration_bounds = array<i64: 1>, scalar_prefetch = 0 : i64, scratch_operands = 0 : i64, tpu.core_type = #tpu.core_type<tc>, window_params = [{transform_indices = @transform_0, window_bounds = array<i64: 16, 128>}, {pipeline_mode = #tpu.pipeline_mode<synchronous>, transform_indices = @transform_1, window_bounds = array<i64: 8, 8>}, {pipeline_mode = #tpu.pipeline_mode<synchronous>, transform_indices = @transform_2, window_bounds = array<i64: 128, 10>}, {pipeline_mode = #tpu.pipeline_mode<synchronous>, transform_indices = @transform_3, window_bounds = array<i64: 1, 10>}, {pipeline_mode = #tpu.pipeline_mode<synchronous>, transform_indices = @transform_4, window_bounds = array<i64: 10, 128>}, {transform_indices = @transform_5, window_bounds = array<i64: 16, 128>}]} {
    %c0 = arith.constant 0 : index
    %c0_0 = arith.constant 0 : index
    %0 = vector.load %arg1[%c0, %c0_0] : memref<16x128xf32, #tpu.memory_space<vmem>>, vector<16x128xf32>
    %1 = vector.shape_cast %0 : vector<16x128xf32> to vector<2x8x128xf32>
    %cst = arith.constant dense<0.000000e+00> : vector<2x128xf32>
    %2 = vector.multi_reduction <add>, %1, %cst [1] : vector<2x8x128xf32> to vector<2x128xf32>
    %c0_1 = arith.constant 0 : index
    %c0_2 = arith.constant 0 : index
    %3 = vector.load %arg3[%c0_1, %c0_2] : memref<128x10xf32, #tpu.memory_space<vmem>>, vector<128x10xf32>
    %cst_3 = arith.constant dense<0.000000e+00> : vector<2x10xf32>
    %4 = tpu.matmul %2, %3, %cst_3 {dimension_numbers = #tpu.dot_dimension_numbers<[1], [0], [0], [1], [0, 0, 1, 1], [], []>} : vector<2x128xf32>, vector<128x10xf32>, vector<2x10xf32> -> vector<2x10xf32>
    %c0_4 = arith.constant 0 : index
    %c0_5 = arith.constant 0 : index
    %5 = vector.load %arg4[%c0_4, %c0_5] : memref<1x10xf32, #tpu.memory_space<vmem>>, vector<1x10xf32>
    %6 = vector.broadcast %5 : vector<1x10xf32> to vector<2x10xf32>
    %7 = arith.addf %4, %6 : vector<2x10xf32>
    %8 = arith.negf %7 : vector<2x10xf32>
    %9 = math.exp %8 : vector<2x10xf32>
    %cst_6 = arith.constant 1.000000e+00 : f32
    %10 = vector.broadcast %cst_6 : f32 to vector<2x10xf32>
    %11 = arith.addf %10, %9 : vector<2x10xf32>
    %12 = arith.divf %10, %11 : vector<2x10xf32>
    %c0_7 = arith.constant 0 : index
    %c0_8 = arith.constant 0 : index
    %13 = vector.load %arg5[%c0_7, %c0_8] : memref<10x128xf32, #tpu.memory_space<vmem>>, vector<10x128xf32>
    %cst_9 = arith.constant dense<0.000000e+00> : vector<2x128xf32>
    %14 = tpu.matmul %12, %13, %cst_9 {dimension_numbers = #tpu.dot_dimension_numbers<[1], [0], [0], [1], [0, 0, 1, 1], [], []>} : vector<2x10xf32>, vector<10x128xf32>, vector<2x128xf32> -> vector<2x128xf32>
    %cst_10 = arith.constant dense<0.000000e+00> : vector<16xf32>
    %15 = vector.multi_reduction <add>, %0, %cst_10 [1] : vector<16x128xf32> to vector<16xf32>
    %16 = vector.shape_cast %15 : vector<16xf32> to vector<16x1xf32>
    %cst_11 = arith.constant 7.812500e-03 : f32
    %17 = vector.broadcast %cst_11 : f32 to vector<16x1xf32>
    %18 = arith.mulf %16, %17 : vector<16x1xf32>
    %c0_12 = arith.constant 0 : index
    %c0_13 = arith.constant 0 : index
    %19 = vector.load %arg2[%c0_12, %c0_13] : memref<8x8xf32, #tpu.memory_space<vmem>>, vector<8x8xf32>
    %20 = vector.extract_strided_slice %18 {offsets = [0, 0], sizes = [8, 1], strides = [1, 1]} : vector<16x1xf32> to vector<8x1xf32>
    %cst_14 = arith.constant dense<0.000000e+00> : vector<8x1xf32>
    %21 = tpu.matmul %19, %20, %cst_14 {dimension_numbers = #tpu.dot_dimension_numbers<[1], [0], [0], [1], [0, 0, 1, 1], [], []>} : vector<8x8xf32>, vector<8x1xf32>, vector<8x1xf32> -> vector<8x1xf32>
    %22 = arith.negf %21 : vector<8x1xf32>
    %23 = math.exp %22 : vector<8x1xf32>
    %cst_15 = arith.constant 1.000000e+00 : f32
    %24 = vector.broadcast %cst_15 : f32 to vector<8x1xf32>
    %25 = arith.addf %24, %23 : vector<8x1xf32>
    %26 = arith.divf %24, %25 : vector<8x1xf32>
    %27 = vector.extract_strided_slice %0 {offsets = [0, 0], sizes = [8, 128], strides = [1, 1]} : vector<16x128xf32> to vector<8x128xf32>
    %28 = vector.extract_strided_slice %14 {offsets = [0, 0], sizes = [1, 128], strides = [1, 1]} : vector<2x128xf32> to vector<1x128xf32>
    %29 = vector.broadcast %26 : vector<8x1xf32> to vector<8x128xf32>
    %30 = vector.broadcast %28 : vector<1x128xf32> to vector<8x128xf32>
    %31 = arith.addf %29, %30 : vector<8x128xf32>
    %32 = arith.mulf %27, %31 : vector<8x128xf32>
    %c0_16 = arith.constant 0 : index
    %c0_17 = arith.constant 0 : index
    %33 = vector.load %arg6[%c0_16, %c0_17] : memref<16x128xf32, #tpu.memory_space<vmem>>, vector<8x128xf32>
    tpu.vector_store %arg6[%c0_16, %c0_17], %32 {strides = array<i32>} : memref<16x128xf32, #tpu.memory_space<vmem>>, vector<8x128xf32>,
    %c0_18 = arith.constant 0 : index
    %c0_19 = arith.constant 0 : index
    %34 = vector.load %arg2[%c0_18, %c0_19] : memref<8x8xf32, #tpu.memory_space<vmem>>, vector<8x8xf32>
    %35 = vector.extract_strided_slice %18 {offsets = [8, 0], sizes = [8, 1], strides = [1, 1]} : vector<16x1xf32> to vector<8x1xf32>
    %cst_20 = arith.constant dense<0.000000e+00> : vector<8x1xf32>
    %36 = tpu.matmul %34, %35, %cst_20 {dimension_numbers = #tpu.dot_dimension_numbers<[1], [0], [0], [1], [0, 0, 1, 1], [], []>} : vector<8x8xf32>, vector<8x1xf32>, vector<8x1xf32> -> vector<8x1xf32>
    %37 = arith.negf %36 : vector<8x1xf32>
    %38 = math.exp %37 : vector<8x1xf32>
    %cst_21 = arith.constant 1.000000e+00 : f32
    %39 = vector.broadcast %cst_21 : f32 to vector<8x1xf32>
    %40 = arith.addf %39, %38 : vector<8x1xf32>
    %41 = arith.divf %39, %40 : vector<8x1xf32>
    %42 = vector.extract_strided_slice %0 {offsets = [8, 0], sizes = [8, 128], strides = [1, 1]} : vector<16x128xf32> to vector<8x128xf32>
    %43 = vector.extract_strided_slice %14 {offsets = [1, 0], sizes = [1, 128], strides = [1, 1]} : vector<2x128xf32> to vector<1x128xf32>
    %44 = vector.broadcast %41 : vector<8x1xf32> to vector<8x128xf32>
    %45 = vector.broadcast %43 : vector<1x128xf32> to vector<8x128xf32>
    %46 = arith.addf %44, %45 : vector<8x128xf32>
    %47 = arith.mulf %42, %46 : vector<8x128xf32>
    %c8 = arith.constant 8 : index
    %c0_22 = arith.constant 0 : index
    %48 = vector.load %arg6[%c8, %c0_22] : memref<16x128xf32, #tpu.memory_space<vmem>>, vector<8x128xf32>
    tpu.vector_store %arg6[%c8, %c0_22], %47 {strides = array<i32>} : memref<16x128xf32, #tpu.memory_space<vmem>>, vector<8x128xf32>,
    return
  }
  func.func @transform_0(%arg0: i32) -> (i32, i32) {
    %c0_i32 = arith.constant 0 : i32
    %c0_i32_0 = arith.constant 0 : i32
    return %arg0, %c0_i32 : i32, i32
  }
  func.func @transform_1(%arg0: i32) -> (i32, i32) {
    %c0_i32 = arith.constant 0 : i32
    %c0_i32_0 = arith.constant 0 : i32
    %c0_i32_1 = arith.constant 0 : i32
    return %c0_i32, %c0_i32_0 : i32, i32
  }
  func.func @transform_2(%arg0: i32) -> (i32, i32) {
    %c0_i32 = arith.constant 0 : i32
    %c0_i32_0 = arith.constant 0 : i32
    %c0_i32_1 = arith.constant 0 : i32
    return %c0_i32, %c0_i32_0 : i32, i32
  }
  func.func @transform_3(%arg0: i32) -> (i32, i32) {
    %c0_i32 = arith.constant 0 : i32
    %c0_i32_0 = arith.constant 0 : i32
    %c0_i32_1 = arith.constant 0 : i32
    return %c0_i32, %c0_i32_0 : i32, i32
  }
  func.func @transform_4(%arg0: i32) -> (i32, i32) {
    %c0_i32 = arith.constant 0 : i32
    %c0_i32_0 = arith.constant 0 : i32
    %c0_i32_1 = arith.constant 0 : i32
    return %c0_i32, %c0_i32_0 : i32, i32
  }
  func.func @transform_5(%arg0: i32) -> (i32, i32) {
    %c0_i32 = arith.constant 0 : i32
    %c0_i32_0 = arith.constant 0 : i32
    return %arg0, %c0_i32 : i32, i32
  }
}

</mosaic_0001>

<bundles_post_ra>
// kernel: tpu_custom_call.1
= control target key start
LH: loop header
LB: loop body
LE: loop exit
PB: predicated region body
PF: predicated region fallthrough
CT: control target
= control target key end

     0   :  { %s425_s0 = inlined_call_operand.vmem [shape: f32[16,128], index: 0, kind: input, shape index: {}]   ;;  %s426_s1 = inlined_call_operand.vmem [shape: f32[8,8], index: 1, kind: input, shape index: {}]   ;;  %s427_s2 = inlined_call_operand.vmem [shape: f32[128,10], index: 2, kind: input, shape index: {}]   ;;  %s428_s3 = inlined_call_operand.vmem [shape: f32[1,10], index: 3, kind: input, shape index: {}]   ;;  %s429_s4 = inlined_call_operand.vmem [shape: f32[10,128], index: 4, kind: input, shape index: {}]   ;;  %s430_s5 = inlined_call_operand.hbm [shape: f32[16,128], index: 5, kind: output, shape index: {}]  }
   0x1   :  { %v347_v0 = vld [vmem:[%s425_s0] sm:$0xff]  ;;  %v50_v1 = vld [vmem:[%s427_s2 + $0x78] sm:$0xff]  ;;  %v49_v2 = vld [vmem:[%s427_s2 + $0x70] sm:$0xff] }
   0x2   :  { %129 = vadd.xlane.f32.xlu0 %v347_v0  ;;  %60 = vmatpush.msra.mxu0 %v50_v1  ;;  %v48_v3 = vld [vmem:[%s427_s2 + $0x68] sm:$0xff]  ;;  %v47_v5 = vld [vmem:[%s427_s2 + $0x60] sm:$0xff]  ;;  %v23_v6 = vrot.slane %v347_v0, 4  ;;  %v46_v8 = vld [vmem:[%s427_s2 + $0x58] sm:$0xff] }
   0x3   :  { %v362_v4 = vld [vmem:[%s425_s0 + $0x8] sm:$0xff] }
   0x4   :  { %61 = vmatpush.msra.mxu0 %v49_v2  ;;  %v29_v7 = vrot.slane %v362_v4, 4 }
   0x6   :  { %62 = vmatpush.msra.mxu0 %v48_v3 }
   0x7   :  { %10 = vsyncpa [#allocation3], 0  ;;  %v45_v9 = vld [vmem:[%s427_s2 + $0x50] sm:$0xff]  ;;  %v24_v10 = vadd.f32 %v23_v6, %v347_v0  ;;  %v30_v11 = vadd.f32 %v29_v7, %v362_v4  ;;  %v44_v12 = vld [vmem:[%s427_s2 + $0x48] sm:$0xff]  ;;  %vm57_vm0 = vcmask 1041409   ;;  %vm136_vm1 = vcmask 64512  }
   0x8   :  { %63 = vmatpush.msra.mxu0 %v47_v5  ;;  %v43_v13 = vld [vmem:[%s427_s2 + $0x40] sm:$0xff]  ;;  %v42_v16 = vld [vmem:[%s427_s2 + $0x38] sm:$0xff]  ;;  %v41_v17 = vld [vmem:[%s427_s2 + $0x30] sm:$0xff]  ;;  %vm105_vm2 = vcmask 1041408   ;;  %vm101_vm7 = vcmask 80896   ;;  %v310_v54 = vmov 0  }
   0x9   :  { %v25_v14 = vrot.slane %v24_v10, 2  ;;  %v31_v15 = vrot.slane %v30_v11, 2  ;;  %v40_v20 = vld [vmem:[%s427_s2 + $0x28] sm:$0xff]  ;;  %v39_v21 = vld [vmem:[%s427_s2 + $0x20] sm:$0xff]  ;;  %v38_v24 = vld [vmem:[%s427_s2 + $0x18] sm:$0xff]  ;;  %269 = vset.pattern.permute.xlu1 %v310_v54  ;;  %270 = vset.pattern.permute.xlu0 %v310_v54  ;;  %s246_s10 = sshll.u32 %s430_s5, 4  ;;  %s247_s10 = int_to_ptr.hbm [resolvable:$true] %s246_s10 }
   0xa   :  { %131 = vadd.xlane.f32.xlu0 %v362_v4  ;;  %64 = vmatpush.msra.mxu0 %v46_v8  ;;  %v37_v25 = vld [vmem:[%s427_s2 + $0x10] sm:$0xff]  ;;  %v36_v28 = vld [vmem:[%s427_s2 + $0x8] sm:$0xff]  ;;  %v35_v29 = vld [vmem:[%s427_s2] sm:$0xff]  ;;  %s312_s11 = smov 128   ;;  %s313_s12 = smov 8  }
   0xb   :  { %v26_v18 = vadd.f32 %v25_v14, %v24_v10  ;;  %v32_v19 = vadd.f32 %v31_v15, %v30_v11  ;;  %v135_v33 = vld [vmem:[%s426_s1] sm:$0xff]  ;;  %v100_v47 = vld [vmem:[%s429_s4 + $0x8] sm:$0x3] }
   0xc   :  { %65 = vmatpush.msra.mxu0 %v45_v9  ;;  %v271_v36 = vld [vmem:[%s428_s3] ss:$0 sm:$0xff]  ;;  %259 = vmatpush.msk.msra.mxu1 %vm105_vm2, %v100_v47 }
   0xd   :  { %v27_v22 = vrot.slane %v26_v18, 1  ;;  %v33_v23 = vrot.slane %v32_v19, 1  ;;  %v99_v51 = vld [vmem:[%s429_s4] sm:$0xff]  ;;  %s311_s4 = smov [#allocation2]  }
   0xe   :  { %66 = vmatpush.msra.mxu0 %v44_v12  ;;  %124 = vmatpush.msra.mxu1 %v99_v51  ;;  %s244_s8 = sshll.u32 %s311_s4, 4  ;;  %s245_s8 = int_to_ptr.vmem [resolvable:$true] %s244_s8 }
   0xf   :  { %v28_v26 = vadd.f32 %v27_v22, %v26_v18  ;;  %v34_v27 = vadd.f32 %v33_v23, %v32_v19 }
  0x10   :  { %67 = vmatpush.msra.mxu0 %v43_v13 }
  0x11   :  { %v58_v30 = vsel %vm57_vm0, %v34_v27, %v28_v26 }
  0x12   :  { %68 = vmatpush.msra.mxu0 %v42_v16 }
  0x14   :  { %69 = vmatpush.msra.mxu0 %v41_v17 }
  0x16   :  { %70 = vmatpush.msra.mxu0 %v40_v20 }
  0x18   :  { %71 = vmatpush.msra.mxu0 %v39_v21 }
  0x1a   :  { %72 = vmatpush.msra.mxu0 %v38_v24 }
  0x1c   :  { %73 = vmatpush.msra.mxu0 %v37_v25 }
  0x1e   :  { %74 = vmatpush.msra.mxu0 %v36_v28 }
  0x20   :  { %75 = vmatpush.msra.mxu0 %v35_v29 }
  0x21   :  { %76 = vmatmul.f32.vlgmr.msra.gmra.mxu0 %v58_v30 }
  0x75   :  { %v130_v31 = vpop.xlane.xlu0 %129 }
  0x76   :  { %v133_v32 = vmul.f32 0.0078125, %v130_v31 }
  0x78   :  { %155 = vmatpush.msra.mxu2 %v133_v32 }
  0x79   :  { %261 = vmatmul.msk.f32.vlgmr.msra.gmra.mxu2 %vm136_vm1, %v135_v33 }
  0x7d   :  { %v132_v34 = vpop.xlane.xlu0 %131 }
  0x7e   :  { %v134_v35 = vmul.f32 0.0078125, %v132_v34 }
  0x80   :  { %207 = vmatpush.msra.mxu3 %v134_v35 }
  0x81   :  { %263 = vmatmul.msk.f32.vlgmr.msra.gmra.mxu3 %vm136_vm1, %v135_v33 }
  0x9e   :  { %v77_v37 = vpop.f32.mrf.mxu0 }
  0x9f   :  { %v78_v38 = vadd.f32 %v271_v36, %v77_v37 }
  0xa1   :  { %v258_v39 = vmul.f32 -1.442695, %v78_v38 }
  0xa3   :  { %272 = vpow2.f32 %v258_v39 }
  0xa9   :  { %v273_v40 = vpop.eup %272 }
  0xaa   :  { %v83_v41 = vadd.f32 1.0, %v273_v40 }
  0xac   :  { %274 = vrcp.f32 %v83_v41  ;;  %v95_v46 = vand.u32 2147483648, %v83_v41  ;;  %vm89_vm3 = vweird.f32 %v83_v41  ;;  %v93_v49 = vand.u32 2147483647, %v83_v41 }
  0xae   :  { %v96_v50 = vor.u32 1.1754944e-38, %v95_v46  ;;  %vm94_vm6 = vcmp.eq.f32.partialorder %v93_v49, 8.507059e+37 }
  0xb2   :  { %v275_v42 = vpop.eup %274 }
  0xb3   :  { %v85_v43 = vmul.f32 %v275_v42, %v83_v41  ;;  %vm90_vm4 = vweird.f32 %v275_v42 }
  0xb4   :  { %vm91_vm5 = vmor %vm89_vm3, %vm90_vm4 }
  0xb5   :  { %v86_v44 = vsub.f32 1.0, %v85_v43 }
  0xb7   :  { %v87_v45 = vmul.f32 %v275_v42, %v86_v44 }
  0xb9   :  { %v88_v48 = vadd.f32 %v275_v42, %v87_v45 }
  0xbb   :  { %v92_v52 = vsel %vm91_vm5, %v275_v42, %v88_v48 }
  0xbc   :  { %v97_v53 = vsel %vm94_vm6, %v96_v50, %v92_v52 }
  0xbd   :  { %260 = vmatmul.msk.f32.vlgmr.msra.gmra.mxu1 %vm101_vm7, %v97_v53 }
  0xfc   :  { %v157_v55 = vpop.f32.mrf.mxu2 }
  0xfd   :  { %v262_v56 = vmul.f32 -1.442695, %v157_v55 }
  0xff   :  { %276 = vpow2.f32 %v262_v56 }
 0x104   :  { %v209_v57 = vpop.f32.mrf.mxu3 }
 0x105   :  { %v277_v58 = vpop.eup %276  ;;  %v264_v59 = vmul.f32 -1.442695, %v209_v57 }
 0x106   :  { %v163_v60 = vadd.f32 1.0, %v277_v58 }
 0x107   :  { %278 = vpow2.f32 %v264_v59 }
 0x108   :  { %280 = vrcp.f32 %v163_v60  ;;  %v175_v3 = vand.u32 2147483648, %v163_v60  ;;  %v173_v6 = vand.u32 2147483647, %v163_v60  ;;  %vm169_vm9 = vweird.f32 %v163_v60 }
 0x10a   :  { %v176_v9 = vor.u32 1.1754944e-38, %v175_v3  ;;  %vm174_vm11 = vcmp.eq.f32.partialorder %v173_v6, 8.507059e+37 }
 0x10d   :  { %v279_v61 = vpop.eup %278 }
 0x10e   :  { %v281_v62 = vpop.eup %280  ;;  %v215_v63 = vadd.f32 1.0, %v279_v61 }
 0x10f   :  { %v165_v1 = vmul.f32 %v281_v62, %v163_v60  ;;  %vm170_vm8 = vweird.f32 %v281_v62 }
 0x110   :  { %282 = vrcp.f32 %v215_v63  ;;  %vm171_vm10 = vmor %vm169_vm9, %vm170_vm8  ;;  %v227_v14 = vand.u32 2147483648, %v215_v63  ;;  %v225_v16 = vand.u32 2147483647, %v215_v63  ;;  %vm221_vm13 = vweird.f32 %v215_v63 }
 0x111   :  { %v166_v2 = vsub.f32 1.0, %v165_v1 }
 0x112   :  { %v228_v18 = vor.u32 1.1754944e-38, %v227_v14  ;;  %vm226_vm15 = vcmp.eq.f32.partialorder %v225_v16, 8.507059e+37 }
 0x113   :  { %v167_v5 = vmul.f32 %v281_v62, %v166_v2 }
 0x115   :  { %v168_v7 = vadd.f32 %v281_v62, %v167_v5 }
 0x116   :  { %v283_v8 = vpop.eup %282 }
 0x117   :  { %v172_v10 = vsel %vm171_vm10, %v281_v62, %v168_v7  ;;  %v217_v11 = vmul.f32 %v283_v8, %v215_v63  ;;  %vm222_vm12 = vweird.f32 %v283_v8 }
 0x118   :  { %v177_v12 = vsel %vm174_vm11, %v176_v9, %v172_v10  ;;  %vm223_vm14 = vmor %vm221_vm13, %vm222_vm12 }
 0x119   :  { %181 = vperm.xlu1 %269, %v177_v12   ;;  %v218_v13 = vsub.f32 1.0, %v217_v11 }
 0x11b   :  { %v219_v15 = vmul.f32 %v283_v8, %v218_v13 }
 0x11d   :  { %v220_v17 = vadd.f32 %v283_v8, %v219_v15 }
 0x11f   :  { %v224_v19 = vsel %vm223_vm14, %v283_v8, %v220_v17 }
 0x120   :  { %v229_v20 = vsel %vm226_vm15, %v228_v18, %v224_v19 }
 0x121   :  { %233 = vperm.xlu1 %269, %v229_v20  }
 0x13a   :  { %v126_v21 = vpop.f32.mrf.mxu1 }
 0x13b   :  { %v184_v22 = vperm.slane %v126_v21, 0  ;;  %v236_v26 = vperm.slane %v126_v21, 1 }
 0x18b   :  { %v182_v23 = vpop.permute.xlu1 %181 }
 0x18c   :  { %v185_v24 = vadd.f32 %v184_v22, %v182_v23 }
 0x18e   :  { %v186_v25 = vmul.f32 %v185_v24, %v347_v0 }
 0x190   :  { %187 = vst [vmem:[#allocation2] sm:$0xff] %v186_v25 }
 0x193   :  { %v234_v27 = vpop.permute.xlu1 %233 }
 0x194   :  { %v237_v28 = vadd.f32 %v236_v26, %v234_v27 }
 0x196   :  { %v238_v29 = vmul.f32 %v237_v28, %v362_v4 }
 0x198   :  { %239 = vst [vmem:[#allocation2 + $0x8] sm:$0xff] %v238_v29 }
 0x199   :  { %252 = dma.vmem_to_hbm [thread:$0]  %s245_s8, 256, %s247_s10, [#allocation3], %s312_s11, %s312_s11, %s313_s12  }
 0x19a   :  { %308 = dma.done.wait [#allocation3], 256  }
 0x19b   :  { %309 = vsyncadd [#allocation3], 4294967040 }
 0x19c   :  { %257 = vsyncpa [#allocation3], 1 }

</bundles_post_ra>
